<compile_context>
chip_gen: v7x
topology: tpu7x:2x2x1
jax: 0.10.0
libtpu: 0.0.40
codegen_flags: <defaults>
</compile_context>

<pallas_src>
import jax
import jax.numpy as jnp
from jax.experimental import pallas as pl
from jax.experimental.pallas import tpu as pltpu


def mlp_kernel(x_ref, w1_ref, b1_ref, w2_ref, b2_ref, o_ref):
    """Feature-major MLP tile.

    x_ref : (in_dim, TB)        activations, batch in lanes
    w1_ref: (hidden, in_dim)    PyTorch fc1.weight layout (out, in)
    b1_ref: (hidden, 1)
    w2_ref: (out_dim, hidden)   PyTorch fc2.weight layout (out, in)
    b2_ref: (out_dim, 1)
    o_ref : (out_dim, TB)       lane-dense, unpadded output
    """
    in_dim = x_ref.shape[0]
    hidden = w1_ref.shape[0]

    # fc1 on the VPU: (hidden,1) * (1,TB) broadcast mul-adds, unrolled over the
    # tiny contraction dim (static at trace time).
    h = w1_ref[:, 0:1] * x_ref[0:1, :]
    for k in range(1, in_dim):
        h = h + w1_ref[:, k:k + 1] * x_ref[k:k + 1, :]
    h = jnp.maximum(h + b1_ref[...], 0.0)          # bias + ReLU, (hidden, TB)

    # fc2 on the VPU as well: (out_dim,1) * (1,TB) mul-adds over hidden=10.
    out = w2_ref[:, 0:1] * h[0:1, :]
    for j in range(1, hidden):
        out = out + w2_ref[:, j:j + 1] * h[j:j + 1, :]
    out = out + b2_ref[...]                         # (out_dim, TB)

    o_ref[...] = out.astype(o_ref.dtype)


def simple_model_forward(x, w1, b1, w2, b2, *, block_batch=4096):
    """Forward pass of SimpleModel.

    x : (B, in_dim) f32, batch-major (PyTorch convention).
    w1: (hidden, in_dim), b1: (hidden,)   -- native torch fc1.weight / fc1.bias
    w2: (out_dim, hidden), b2: (out_dim,) -- native torch fc2.weight / fc2.bias
    Returns (B, out_dim) f32.
    """
    assert block_batch % 128 == 0, "batch tile must be lane-aligned (128)"
    B, in_dim = x.shape
    hidden, _ = w1.shape
    out_dim, _ = w2.shape

    # Feature-major: transpose x once (cheap, fuses under jit); biases as columns.
    xt = x.T                          # (in_dim, B)
    b1c = b1.reshape(hidden, 1)
    b2c = b2.reshape(out_dim, 1)

    if B <= block_batch:
        # Gridless path: whole problem resident in VMEM, single invocation,
        # no pipeline prologue/epilogue or per-step bookkeeping.
        out_t = pl.pallas_call(
            mlp_kernel,
            out_shape=jax.ShapeDtypeStruct((out_dim, B), jnp.float32),
            in_specs=[pl.BlockSpec(memory_space=pltpu.MemorySpace.VMEM)] * 5,
            out_specs=pl.BlockSpec(memory_space=pltpu.MemorySpace.VMEM),
        )(xt, w1, b1c, w2, b2c)
        return out_t.T

    # Batch-tiled path: grid over batch lanes only; weights/biases stay
    # VMEM-resident (index_map -> (0, 0)).  B > block_batch guarantees >= 2
    # grid steps, so both v7x TensorCores get work via the "parallel" axis.
    TB = block_batch
    out_t = pl.pallas_call(
        mlp_kernel,
        out_shape=jax.ShapeDtypeStruct((out_dim, B), jnp.float32),
        grid=(pl.cdiv(B, TB),),                     # ragged last block is clipped
        in_specs=[
            pl.BlockSpec((in_dim, TB), lambda i: (0, i)),
            pl.BlockSpec((hidden, in_dim), lambda i: (0, 0)),
            pl.BlockSpec((hidden, 1), lambda i: (0, 0)),
            pl.BlockSpec((out_dim, hidden), lambda i: (0, 0)),
            pl.BlockSpec((out_dim, 1), lambda i: (0, 0)),
        ],
        out_specs=pl.BlockSpec((out_dim, TB), lambda i: (0, i)),
        compiler_params=pltpu.CompilerParams(
            dimension_semantics=("parallel",),      # shard batch across TCs
        ),
    )(xt, w1, b1c, w2, b2c)
    return out_t.T


if __name__ == "__main__":
    input_dim, hidden_dim, output_dim = 2, 10, 3
    batch = 8

    key = jax.random.PRNGKey(0)
    k_x, k_w1, k_b1, k_w2, k_b2, k_xl = jax.random.split(key, 6)

    # Deterministic synthetic parameters, native PyTorch nn.Linear layout
    # (weight = (out_features, in_features), uniform(-1/sqrt(fan_in), ...)).
    bound1 = 1.0 / jnp.sqrt(input_dim)
    bound2 = 1.0 / jnp.sqrt(hidden_dim)
    w1 = jax.random.uniform(k_w1, (hidden_dim, input_dim), jnp.float32, -bound1, bound1)
    b1 = jax.random.uniform(k_b1, (hidden_dim,), jnp.float32, -bound1, bound1)
    w2 = jax.random.uniform(k_w2, (output_dim, hidden_dim), jnp.float32, -bound2, bound2)
    b2 = jax.random.uniform(k_b2, (output_dim,), jnp.float32, -bound2, bound2)

    def ref_fwd(xin):
        return jnp.maximum(xin @ w1.T + b1, 0.0) @ w2.T + b2

    fwd = jax.jit(simple_model_forward)

    # --- Small batch (gridless path), matches the test's usage. ---
    x = jax.random.normal(k_x, (batch, input_dim), jnp.float32)
    out = jax.block_until_ready(fwd(x, w1, b1, w2, b2))
    assert out.shape == (batch, output_dim)
    assert jnp.allclose(out, ref_fwd(x), atol=1e-5, rtol=1e-5)

    # --- Large batch: batch-tiled "parallel" grid, 3 steps, ragged last block. ---
    big_batch = 10000
    xl = jax.random.normal(k_xl, (big_batch, input_dim), jnp.float32)
    out_l = jax.block_until_ready(fwd(xl, w1, b1, w2, b2))
    assert out_l.shape == (big_batch, output_dim)
    assert jnp.allclose(out_l, ref_fwd(xl), atol=1e-5, rtol=1e-5)

    print("KERNEL_OK")
</pallas_src>

<mosaic_0001>
module attributes {stable_mosaic.version = 11 : i64} {
  func.func @mlp_kernel(%arg0: memref<2x8xf32, #tpu.memory_space<vmem>>, %arg1: memref<10x2xf32, #tpu.memory_space<vmem>>, %arg2: memref<10x1xf32, #tpu.memory_space<vmem>>, %arg3: memref<3x10xf32, #tpu.memory_space<vmem>>, %arg4: memref<3x1xf32, #tpu.memory_space<vmem>>, %arg5: memref<3x8xf32, #tpu.memory_space<vmem>>) attributes {dimension_semantics = [], scalar_prefetch = 0 : i64, scratch_operands = 0 : i64, tpu.core_type = #tpu.core_type<tc>} {
    %c0 = arith.constant 0 : index
    %c0_0 = arith.constant 0 : index
    %0 = vector.load %arg1[%c0, %c0_0] : memref<10x2xf32, #tpu.memory_space<vmem>>, vector<10x1xf32>
    %c0_1 = arith.constant 0 : index
    %c0_2 = arith.constant 0 : index
    %1 = vector.load %arg0[%c0_1, %c0_2] : memref<2x8xf32, #tpu.memory_space<vmem>>, vector<1x8xf32>
    %2 = vector.broadcast %0 : vector<10x1xf32> to vector<10x8xf32>
    %3 = vector.broadcast %1 : vector<1x8xf32> to vector<10x8xf32>
    %4 = arith.mulf %2, %3 : vector<10x8xf32>
    %c0_3 = arith.constant 0 : index
    %c1 = arith.constant 1 : index
    %5 = vector.load %arg1[%c0_3, %c1] : memref<10x2xf32, #tpu.memory_space<vmem>>, vector<10x1xf32>
    %c1_4 = arith.constant 1 : index
    %c0_5 = arith.constant 0 : index
    %6 = vector.load %arg0[%c1_4, %c0_5] : memref<2x8xf32, #tpu.memory_space<vmem>>, vector<1x8xf32>
    %7 = vector.broadcast %5 : vector<10x1xf32> to vector<10x8xf32>
    %8 = vector.broadcast %6 : vector<1x8xf32> to vector<10x8xf32>
    %9 = arith.mulf %7, %8 : vector<10x8xf32>
    %10 = arith.addf %4, %9 : vector<10x8xf32>
    %c0_6 = arith.constant 0 : index
    %c0_7 = arith.constant 0 : index
    %11 = vector.load %arg2[%c0_6, %c0_7] : memref<10x1xf32, #tpu.memory_space<vmem>>, vector<10x1xf32>
    %12 = vector.broadcast %11 : vector<10x1xf32> to vector<10x8xf32>
    %13 = arith.addf %10, %12 : vector<10x8xf32>
    %cst = arith.constant 0.000000e+00 : f32
    %14 = vector.broadcast %cst : f32 to vector<10x8xf32>
    %15 = arith.maximumf %13, %14 : vector<10x8xf32>
    %c0_8 = arith.constant 0 : index
    %c0_9 = arith.constant 0 : index
    %16 = vector.load %arg3[%c0_8, %c0_9] : memref<3x10xf32, #tpu.memory_space<vmem>>, vector<3x1xf32>
    %17 = vector.extract_strided_slice %15 {offsets = [0, 0], sizes = [1, 8], strides = [1, 1]} : vector<10x8xf32> to vector<1x8xf32>
    %18 = vector.broadcast %16 : vector<3x1xf32> to vector<3x8xf32>
    %19 = vector.broadcast %17 : vector<1x8xf32> to vector<3x8xf32>
    %20 = arith.mulf %18, %19 : vector<3x8xf32>
    %c0_10 = arith.constant 0 : index
    %c1_11 = arith.constant 1 : index
    %21 = vector.load %arg3[%c0_10, %c1_11] : memref<3x10xf32, #tpu.memory_space<vmem>>, vector<3x1xf32>
    %22 = vector.extract_strided_slice %15 {offsets = [1, 0], sizes = [1, 8], strides = [1, 1]} : vector<10x8xf32> to vector<1x8xf32>
    %23 = vector.broadcast %21 : vector<3x1xf32> to vector<3x8xf32>
    %24 = vector.broadcast %22 : vector<1x8xf32> to vector<3x8xf32>
    %25 = arith.mulf %23, %24 : vector<3x8xf32>
    %26 = arith.addf %20, %25 : vector<3x8xf32>
    %c0_12 = arith.constant 0 : index
    %c2 = arith.constant 2 : index
    %27 = vector.load %arg3[%c0_12, %c2] : memref<3x10xf32, #tpu.memory_space<vmem>>, vector<3x1xf32>
    %28 = vector.extract_strided_slice %15 {offsets = [2, 0], sizes = [1, 8], strides = [1, 1]} : vector<10x8xf32> to vector<1x8xf32>
    %29 = vector.broadcast %27 : vector<3x1xf32> to vector<3x8xf32>
    %30 = vector.broadcast %28 : vector<1x8xf32> to vector<3x8xf32>
    %31 = arith.mulf %29, %30 : vector<3x8xf32>
    %32 = arith.addf %26, %31 : vector<3x8xf32>
    %c0_13 = arith.constant 0 : index
    %c3 = arith.constant 3 : index
    %33 = vector.load %arg3[%c0_13, %c3] : memref<3x10xf32, #tpu.memory_space<vmem>>, vector<3x1xf32>
    %34 = vector.extract_strided_slice %15 {offsets = [3, 0], sizes = [1, 8], strides = [1, 1]} : vector<10x8xf32> to vector<1x8xf32>
    %35 = vector.broadcast %33 : vector<3x1xf32> to vector<3x8xf32>
    %36 = vector.broadcast %34 : vector<1x8xf32> to vector<3x8xf32>
    %37 = arith.mulf %35, %36 : vector<3x8xf32>
    %38 = arith.addf %32, %37 : vector<3x8xf32>
    %c0_14 = arith.constant 0 : index
    %c4 = arith.constant 4 : index
    %39 = vector.load %arg3[%c0_14, %c4] : memref<3x10xf32, #tpu.memory_space<vmem>>, vector<3x1xf32>
    %40 = vector.extract_strided_slice %15 {offsets = [4, 0], sizes = [1, 8], strides = [1, 1]} : vector<10x8xf32> to vector<1x8xf32>
    %41 = vector.broadcast %39 : vector<3x1xf32> to vector<3x8xf32>
    %42 = vector.broadcast %40 : vector<1x8xf32> to vector<3x8xf32>
    %43 = arith.mulf %41, %42 : vector<3x8xf32>
    %44 = arith.addf %38, %43 : vector<3x8xf32>
    %c0_15 = arith.constant 0 : index
    %c5 = arith.constant 5 : index
    %45 = vector.load %arg3[%c0_15, %c5] : memref<3x10xf32, #tpu.memory_space<vmem>>, vector<3x1xf32>
    %46 = vector.extract_strided_slice %15 {offsets = [5, 0], sizes = [1, 8], strides = [1, 1]} : vector<10x8xf32> to vector<1x8xf32>
    %47 = vector.broadcast %45 : vector<3x1xf32> to vector<3x8xf32>
    %48 = vector.broadcast %46 : vector<1x8xf32> to vector<3x8xf32>
    %49 = arith.mulf %47, %48 : vector<3x8xf32>
    %50 = arith.addf %44, %49 : vector<3x8xf32>
    %c0_16 = arith.constant 0 : index
    %c6 = arith.constant 6 : index
    %51 = vector.load %arg3[%c0_16, %c6] : memref<3x10xf32, #tpu.memory_space<vmem>>, vector<3x1xf32>
    %52 = vector.extract_strided_slice %15 {offsets = [6, 0], sizes = [1, 8], strides = [1, 1]} : vector<10x8xf32> to vector<1x8xf32>
    %53 = vector.broadcast %51 : vector<3x1xf32> to vector<3x8xf32>
    %54 = vector.broadcast %52 : vector<1x8xf32> to vector<3x8xf32>
    %55 = arith.mulf %53, %54 : vector<3x8xf32>
    %56 = arith.addf %50, %55 : vector<3x8xf32>
    %c0_17 = arith.constant 0 : index
    %c7 = arith.constant 7 : index
    %57 = vector.load %arg3[%c0_17, %c7] : memref<3x10xf32, #tpu.memory_space<vmem>>, vector<3x1xf32>
    %58 = vector.extract_strided_slice %15 {offsets = [7, 0], sizes = [1, 8], strides = [1, 1]} : vector<10x8xf32> to vector<1x8xf32>
    %59 = vector.broadcast %57 : vector<3x1xf32> to vector<3x8xf32>
    %60 = vector.broadcast %58 : vector<1x8xf32> to vector<3x8xf32>
    %61 = arith.mulf %59, %60 : vector<3x8xf32>
    %62 = arith.addf %56, %61 : vector<3x8xf32>
    %c0_18 = arith.constant 0 : index
    %c8 = arith.constant 8 : index
    %63 = vector.load %arg3[%c0_18, %c8] : memref<3x10xf32, #tpu.memory_space<vmem>>, vector<3x1xf32>
    %64 = vector.extract_strided_slice %15 {offsets = [8, 0], sizes = [1, 8], strides = [1, 1]} : vector<10x8xf32> to vector<1x8xf32>
    %65 = vector.broadcast %63 : vector<3x1xf32> to vector<3x8xf32>
    %66 = vector.broadcast %64 : vector<1x8xf32> to vector<3x8xf32>
    %67 = arith.mulf %65, %66 : vector<3x8xf32>
    %68 = arith.addf %62, %67 : vector<3x8xf32>
    %c0_19 = arith.constant 0 : index
    %c9 = arith.constant 9 : index
    %69 = vector.load %arg3[%c0_19, %c9] : memref<3x10xf32, #tpu.memory_space<vmem>>, vector<3x1xf32>
    %70 = vector.extract_strided_slice %15 {offsets = [9, 0], sizes = [1, 8], strides = [1, 1]} : vector<10x8xf32> to vector<1x8xf32>
    %71 = vector.broadcast %69 : vector<3x1xf32> to vector<3x8xf32>
    %72 = vector.broadcast %70 : vector<1x8xf32> to vector<3x8xf32>
    %73 = arith.mulf %71, %72 : vector<3x8xf32>
    %74 = arith.addf %68, %73 : vector<3x8xf32>
    %c0_20 = arith.constant 0 : index
    %c0_21 = arith.constant 0 : index
    %75 = vector.load %arg4[%c0_20, %c0_21] : memref<3x1xf32, #tpu.memory_space<vmem>>, vector<3x1xf32>
    %76 = vector.broadcast %75 : vector<3x1xf32> to vector<3x8xf32>
    %77 = arith.addf %74, %76 : vector<3x8xf32>
    %c0_22 = arith.constant 0 : index
    %c0_23 = arith.constant 0 : index
    %78 = vector.load %arg5[%c0_22, %c0_23] : memref<3x8xf32, #tpu.memory_space<vmem>>, vector<3x8xf32>
    tpu.vector_store %arg5[%c0_22, %c0_23], %77 {strides = array<i32>} : memref<3x8xf32, #tpu.memory_space<vmem>>, vector<3x8xf32>,
    return
  }
}

</mosaic_0001>

<bundles_post_ra>
// kernel: simple_model_forward.1
= control target key start
LH: loop header
LB: loop body
LE: loop exit
PB: predicated region body
PF: predicated region fallthrough
CT: control target
= control target key end

     0   :  { %v251_v2 = vmov 0   ;;  %s328_s0 = inlined_call_operand.vmem [shape: f32[2,8], index: 0, kind: input, shape index: {}]   ;;  %s329_s1 = inlined_call_operand.vmem [shape: f32[10,2], index: 1, kind: input, shape index: {}]   ;;  %s330_s2 = inlined_call_operand.vmem [shape: f32[10,1], index: 2, kind: input, shape index: {}]   ;;  %s331_s3 = inlined_call_operand.vmem [shape: f32[3,10], index: 3, kind: input, shape index: {}]   ;;  %s332_s4 = inlined_call_operand.vmem [shape: f32[3,1], index: 4, kind: input, shape index: {}]   ;;  %s333_s5 = inlined_call_operand.hbm [shape: f32[3,8], index: 5, kind: output, shape index: {}]  }
   0x1   :  { %v57_v0 = vld [vmem:[%s330_s2] sm:$0xff]  ;;  %212 = vset.pattern.permute.xlu1 %v251_v2  ;;  %210 = vset.pattern.permute.xlu0 %v251_v2 }
   0x2   :  { %v21_v1 = vld [vmem:[%s329_s1] sm:$0xff]  ;;  %61 = vperm.xlu1 %212, %v57_v0  }
   0x3   :  { %26 = vperm.xlu0 %210, %v21_v1   ;;  %v73_v3 = vld [vmem:[%s331_s3] sm:$0x7] }
   0x4   :  { %10 = vsyncpa [#allocation3], 0  ;;  %v252_v4 = vmov 1   ;;  %v253_v5 = vmov 2   ;;  %v22_v6 = vld [vmem:[%s329_s1 + $0x8] sm:$0x3]  ;;  %v79_v22 = vlaneseq }
   0x5   :  { %v254_v7 = vmov 3   ;;  %v255_v8 = vmov 5   ;;  %v256_v9 = vmov 4   ;;  %v257_v10 = vmov 8   ;;  %v58_v11 = vld [vmem:[%s330_s2 + $0x8] sm:$0x3] }
   0x6   :  { %76 = vperm.xlu1 %212, %v73_v3   ;;  %v258_v12 = vmov 6   ;;  %v259_v13 = vmov 7   ;;  %v260_v14 = vmov 9   ;;  %v174_v15 = vld [vmem:[%s332_s4] sm:$0x7]  ;;  %v80_v26 = vshrl.u32 %v79_v22, 7 }
   0x7   :  { %211 = vset.pattern.permute.xlu0 %v252_v4  ;;  %v197_v18 = vld [vmem:[%s328_s0] ss:$0 sm:$0xff]  ;;  %v198_v19 = vld [vmem:[%s328_s0 + $0x1] ss:$0 sm:$0xff]  ;;  %s261_s0 = smov [#allocation2]   ;;  %vm181_vm0 = vcmask 59392  }
   0x8   :  { %42 = vperm.xlu0 %211, %v21_v1   ;;  %v81_v30 = vsub.s32 0, %v80_v26  ;;  %v90_v31 = vsub.s32 1, %v80_v26  ;;  %v100_v35 = vsub.s32 2, %v80_v26  ;;  %v110_v41 = vsub.s32 3, %v80_v26  ;;  %s189_s4 = sshll.u32 %s261_s0, 4  ;;  %s190_s4 = int_to_ptr.vmem [resolvable:$true] %s189_s4 }
   0x9   :  { %v120_v44 = vsub.s32 4, %v80_v26  ;;  %v130_v53 = vsub.s32 5, %v80_v26  ;;  %v140_v58 = vsub.s32 6, %v80_v26  ;;  %v150_v61 = vsub.s32 7, %v80_v26  ;;  %s227_s6 = scalar_lea.vmem %s190_s4, 64  ;;  %p232_p1 = scmp.lt.s32.totalorder %s190_s4, %s190_s4 }
   0xa   :  { %213 = vset.pattern.permute.xlu1 %v252_v4  ;;  %p228_p0 = scmp.ne.s32.totalorder %s190_s4, %s227_s6  ;;  %p233_p2 = scmp.lt.s32.totalorder %s227_s6, %s227_s6 }
   0xb   :  { %85 = vperm.xlu1 %213, %v73_v3  }
   0xc   :  { %214 = vset.pattern.permute.xlu0 %v253_v5  ;;  %p234_p3 = por %p233_p2, %p232_p1 }
   0xd   :  { %95 = vperm.xlu0 %214, %v73_v3  }
   0xe   :  { %p235_p4 = pnand %p234_p3, %p228_p0 }
   0xf   :  { %215 = vset.pattern.permute.xlu1 %v251_v2 }
  0x10   :  { %31 = vperm.xlu1 %215, %v22_v6  }
  0x11   :  { %217 = vset.pattern.permute.xlu0 %v254_v7 }
  0x12   :  { %105 = vperm.xlu0 %217, %v73_v3  }
  0x14   :  { %216 = vset.pattern.permute.xlu1 %v252_v4 }
  0x15   :  { %46 = vperm.xlu1 %216, %v22_v6  }
  0x16   :  { %220 = vset.pattern.permute.xlu0 %v255_v8 }
  0x17   :  { %125 = vperm.xlu0 %220, %v73_v3  }
  0x19   :  { %218 = vset.pattern.permute.xlu1 %v256_v9 }
  0x1a   :  { %115 = vperm.xlu1 %218, %v73_v3  }
  0x1b   :  { %223 = vset.pattern.permute.xlu0 %v257_v10 }
  0x1c   :  { %155 = vperm.xlu0 %223, %v73_v3  }
  0x1e   :  { %219 = vset.pattern.permute.xlu1 %v251_v2 }
  0x1f   :  { %66 = vperm.xlu1 %219, %v58_v11  }
  0x20   :  { %226 = vset.pattern.permute.xlu0 %v251_v2 }
  0x23   :  { %221 = vset.pattern.permute.xlu1 %v258_v12 }
  0x24   :  { %135 = vperm.xlu1 %221, %v73_v3  }
  0x28   :  { %222 = vset.pattern.permute.xlu1 %v259_v13 }
  0x29   :  { %145 = vperm.xlu1 %222, %v73_v3  }
  0x2d   :  { %224 = vset.pattern.permute.xlu1 %v260_v14 }
  0x2e   :  { %165 = vperm.xlu1 %224, %v73_v3  }
  0x32   :  { %225 = vset.pattern.permute.xlu1 %v251_v2 }
  0x33   :  { %177 = vperm.xlu1 %225, %v174_v15  }
  0x81   :  { %v62_v16 = vpop.permute.xlu1 %61 }
  0x82   :  { %v27_v17 = vpop.permute.xlu0 %26 }
  0x83   :  { %v38_v20 = vmul.f32 %v197_v18, %v27_v17 }
  0x85   :  { %v77_v21 = vpop.permute.xlu1 %76 }
  0x87   :  { %v43_v23 = vpop.permute.xlu0 %42 }
  0x88   :  { %v53_v24 = vmul.f32 %v198_v19, %v43_v23 }
  0x8a   :  { %v55_v25 = vadd.f32 %v53_v24, %v38_v20  ;;  %v86_v27 = vpop.permute.xlu1 %85 }
  0x8c   :  { %v69_v28 = vadd.f32 %v62_v16, %v55_v25  ;;  %v96_v39 = vpop.permute.xlu0 %95 }
  0x8e   :  { %v71_v29 = vmax.f32 %v69_v28, 0.0 }
  0x8f   :  { %v32_v32 = vpop.permute.xlu1 %31 }
  0x90   :  { %v82_v33 = vrot.slane %v71_v29, %v81_v30  ;;  %v91_v34 = vrot.slane %v71_v29, %v90_v31  ;;  %v101_v40 = vrot.slane %v71_v29, %v100_v35  ;;  %v39_v47 = vmul.f32 %v197_v18, %v32_v32 }
  0x91   :  { %v111_v48 = vrot.slane %v71_v29, %v110_v41  ;;  %v106_v49 = vpop.permute.xlu0 %105  ;;  %v121_v51 = vrot.slane %v71_v29, %v120_v44  ;;  %v131_v62 = vrot.slane %v71_v29, %v130_v53  ;;  %v141_v2 = vrot.slane %v71_v29, %v140_v58 }
  0x92   :  { %v83_v37 = vmul.f32 %v82_v33, %v77_v21  ;;  %v92_v38 = vmul.f32 %v91_v34, %v86_v27  ;;  %v102_v46 = vmul.f32 %v101_v40, %v96_v39  ;;  %v151_v7 = vrot.slane %v71_v29, %v150_v61 }
  0x93   :  { %v112_v55 = vmul.f32 %v111_v48, %v106_v49 }
  0x94   :  { %v47_v36 = vpop.permute.xlu1 %46  ;;  %v93_v42 = vadd.f32 %v92_v38, %v83_v37 }
  0x95   :  { %v54_v43 = vmul.f32 %v198_v19, %v47_v36 }
  0x96   :  { %v103_v50 = vadd.f32 %v102_v46, %v93_v42  ;;  %v126_v60 = vpop.permute.xlu0 %125 }
  0x97   :  { %v56_v52 = vadd.f32 %v54_v43, %v39_v47  ;;  %v132_v3 = vmul.f32 %v131_v62, %v126_v60 }
  0x98   :  { %v113_v59 = vadd.f32 %v112_v55, %v103_v50 }
  0x99   :  { %v116_v45 = vpop.permute.xlu1 %115 }
  0x9a   :  { %v122_v56 = vmul.f32 %v121_v51, %v116_v45 }
  0x9b   :  { %v156_v8 = vpop.permute.xlu0 %155 }
  0x9c   :  { %v123_v63 = vadd.f32 %v122_v56, %v113_v59 }
  0x9e   :  { %v67_v54 = vpop.permute.xlu1 %66  ;;  %v133_v5 = vadd.f32 %v132_v3, %v123_v63 }
  0x9f   :  { %v70_v57 = vadd.f32 %v67_v54, %v56_v52 }
  0xa1   :  { %v72_v0 = vmax.f32 %v70_v57, 0.0 }
  0xa3   :  { %v136_v1 = vpop.permute.xlu1 %135  ;;  %v161_v6 = vrot.slane %v72_v0, %v81_v30  ;;  %v171_v14 = vrot.slane %v72_v0, %v90_v31 }
  0xa4   :  { %v142_v4 = vmul.f32 %v141_v2, %v136_v1 }
  0xa5   :  { %v162_v12 = vmul.f32 %v161_v6, %v156_v8 }
  0xa6   :  { %v143_v10 = vadd.f32 %v142_v4, %v133_v5 }
  0xa8   :  { %v146_v9 = vpop.permute.xlu1 %145 }
  0xa9   :  { %v152_v11 = vmul.f32 %v151_v7, %v146_v9 }
  0xab   :  { %v153_v13 = vadd.f32 %v152_v11, %v143_v10 }
  0xad   :  { %v166_v15 = vpop.permute.xlu1 %165  ;;  %v163_v16 = vadd.f32 %v162_v12, %v153_v13 }
  0xae   :  { %v172_v17 = vmul.f32 %v171_v14, %v166_v15 }
  0xb0   :  { %v173_v18 = vadd.f32 %v172_v17, %v163_v16 }
  0xb2   :  { %v178_v19 = vpop.permute.xlu1 %177 }
  0xb3   :  { %v180_v20 = vadd.f32 %v178_v19, %v173_v18 }
  0xb5   :  { %182 = vst.msk [vmem:[#allocation2] sm:$0x7] %vm181_vm0, %v180_v20 }
  0xb6   :  { %238 = shalt.err (!%p235_p4)
}
  0xb7   :  { %s239_s9 = scalar_lea.hbm %s333_s5, 64 }
  0xb8   :  { %p240_p5 = scmp.ne.s32.totalorder %s333_s5, %s239_s9  ;;  %p243_p6 = scmp.lt.u32.totalorder %s239_s9, %s333_s5 }
  0xba   :  { %p245_p7 = pnand %p243_p6, %p240_p5 }
  0xbc   :  { %248 = shalt.err (!%p245_p7)
}
  0xbd   :  { %192 = dma.vmem_to_hbm [thread:$0]  %s190_s4, 64, %s333_s5, [#allocation3]  }
  0xbe   :  { %249 = dma.done.wait [#allocation3], 64  }
  0xbf   :  { %250 = vsyncadd [#allocation3], 4294967232 }
  0xc0   :  { %196 = vsyncpa [#allocation3], 1 }

</bundles_post_ra>
